<compile_context>
chip_gen: v5e
topology: v5e:2x2
jax: 0.10.0
libtpu: 0.0.40
codegen_flags: <defaults>
</compile_context>

<pallas_src>
import functools

import numpy as np

import jax
import jax.numpy as jnp
from jax import lax
from jax.experimental import pallas as pl
from jax.experimental.pallas import tpu as pltpu


# Safe on v5e/v6e (128 MiB physical) and v7x (64 MiB physical); tiles below are
# sized to stay far under this even with double-buffered inputs.
_VMEM_LIMIT = 32 * 1024 * 1024


def _pick_tile(dim, candidates):
    """Largest candidate that divides `dim`; else the full dim (always legal)."""
    for c in candidates:
        if c <= dim and dim % c == 0:
            return c
    return dim


# ---------------------------------------------------------------------------
# Tiled linear:  out = x @ w_t   (w_t already transposed, bf16 MXU operands)
# ---------------------------------------------------------------------------
def _matmul_kernel(x_ref, w_ref, o_ref, acc_ref):
    @pl.when(pl.program_id(2) == 0)
    def _():
        acc_ref[...] = jnp.zeros_like(acc_ref)

    acc_ref[...] += jnp.dot(
        x_ref[...].astype(jnp.bfloat16),
        w_ref[...].astype(jnp.bfloat16),
        preferred_element_type=jnp.float32,
    )

    @pl.when(pl.program_id(2) == pl.num_programs(2) - 1)
    def _():
        o_ref[...] = acc_ref[...].astype(o_ref.dtype)


def pallas_linear(x, w_t, *, out_dtype=None, tm=256, tn=256, tk=512):
    M, K = x.shape
    K2, N = w_t.shape
    assert K == K2
    out_dtype = x.dtype if out_dtype is None else out_dtype

    tm = _pick_tile(M, (tm, 128, 64, 32, 16, 8))
    tn = _pick_tile(N, (tn, 128))
    tk = _pick_tile(K, (tk, 256, 128))

    cost = pl.CostEstimate(
        flops=2 * M * N * K,
        transcendentals=0,
        bytes_accessed=int(M * K * np.dtype(x.dtype).itemsize
                           + K * N * np.dtype(w_t.dtype).itemsize
                           + M * N * np.dtype(out_dtype).itemsize),
    )
    return pl.pallas_call(
        _matmul_kernel,
        out_shape=jax.ShapeDtypeStruct((M, N), out_dtype),
        grid=(M // tm, N // tn, K // tk),
        in_specs=[
            pl.BlockSpec((tm, tk), lambda i, j, k: (i, k)),
            pl.BlockSpec((tk, tn), lambda i, j, k: (k, j)),
        ],
        out_specs=pl.BlockSpec((tm, tn), lambda i, j, k: (i, j)),
        scratch_shapes=[pltpu.VMEM((tm, tn), jnp.float32)],
        compiler_params=pltpu.CompilerParams(
            dimension_semantics=("parallel", "parallel", "arbitrary"),
            vmem_limit_bytes=_VMEM_LIMIT,
        ),
        cost_estimate=cost,
    )(x, w_t)


# ---------------------------------------------------------------------------
# Tiled linear with fused per-head LayerNorm epilogue (the V projection):
#   out[:, h*D:(h+1)*D] = LayerNorm(x @ w_t)[:, h*D:(h+1)*D] * gamma + beta
# ---------------------------------------------------------------------------
def _matmul_vnorm_kernel(x_ref, w_ref, g_ref, b_ref, o_ref, acc_ref, *,
                         num_heads, head_dim, eps):
    kk = pl.program_id(1)

    @pl.when(kk == 0)
    def _():
        acc_ref[...] = jnp.zeros_like(acc_ref)

    acc_ref[...] += jnp.dot(
        x_ref[...].astype(jnp.bfloat16),
        w_ref[...].astype(jnp.bfloat16),
        preferred_element_type=jnp.float32,
    )

    @pl.when(kk == pl.num_programs(1) - 1)
    def _():
        g = g_ref[...].astype(jnp.float32)   # (1, head_dim)
        b = b_ref[...].astype(jnp.float32)
        for h in range(num_heads):           # static unroll over heads
            sl = slice(h * head_dim, (h + 1) * head_dim)
            vh = acc_ref[:, sl]              # (tm, head_dim) f32
            mean = jnp.mean(vh, axis=-1, keepdims=True)
            var = jnp.mean(jnp.square(vh - mean), axis=-1, keepdims=True)
            vn = (vh - mean) * lax.rsqrt(var + eps) * g + b
            o_ref[:, sl] = vn.astype(o_ref.dtype)


def pallas_linear_vnorm(x, w_t, gamma, beta, *, num_heads, head_dim, eps=1e-5,
                        out_dtype=None, tm=256, tk=512):
    M, K = x.shape
    K2, N = w_t.shape
    assert K == K2 and N == num_heads * head_dim
    out_dtype = x.dtype if out_dtype is None else out_dtype

    tm = _pick_tile(M, (tm, 128, 64, 32, 16, 8))
    tk = _pick_tile(K, (tk, 256, 128))

    kernel = functools.partial(_matmul_vnorm_kernel, num_heads=num_heads,
                               head_dim=head_dim, eps=float(eps))
    cost = pl.CostEstimate(
        flops=2 * M * N * K,
        transcendentals=M * num_heads,
        bytes_accessed=int(M * K * np.dtype(x.dtype).itemsize
                           + K * N * np.dtype(w_t.dtype).itemsize
                           + M * N * np.dtype(out_dtype).itemsize),
    )
    return pl.pallas_call(
        kernel,
        out_shape=jax.ShapeDtypeStruct((M, N), out_dtype),
        grid=(M // tm, K // tk),
        in_specs=[
            pl.BlockSpec((tm, tk), lambda i, k: (i, k)),
            pl.BlockSpec((tk, N), lambda i, k: (k, 0)),
            pl.BlockSpec((1, head_dim), lambda i, k: (0, 0)),
            pl.BlockSpec((1, head_dim), lambda i, k: (0, 0)),
        ],
        out_specs=pl.BlockSpec((tm, N), lambda i, k: (i, 0)),
        scratch_shapes=[pltpu.VMEM((tm, N), jnp.float32)],
        compiler_params=pltpu.CompilerParams(
            dimension_semantics=("parallel", "arbitrary"),
            vmem_limit_bytes=_VMEM_LIMIT,
        ),
        cost_estimate=cost,
    )(x, w_t, gamma, beta)


# ---------------------------------------------------------------------------
# Sigmoid cross-attention, tiled over (batch, q tiles, kv tiles).
#   q: (B, Sq, H*Dq)   k, v: (B, Sk, H*Dkv)   (v already LayerNormed)
#   out: (B, Sq, H*Dkv)  ==  attn_times_v.flatten(2) of the torch module.
# ---------------------------------------------------------------------------
def _sigmoid_attn_kernel(q_ref, k_ref, v_ref, o_ref, acc_ref, *,
                         num_heads, d_q, d_kv, sigmoid_bias, causal,
                         seq_q, seq_k, tq, tk):
    qi = pl.program_id(1)
    ki = pl.program_id(2)

    @pl.when(ki == 0)
    def _():
        acc_ref[...] = jnp.zeros_like(acc_ref)

    def compute():
        q = q_ref[0].astype(jnp.bfloat16)   # (tq, H*d_q)
        k = k_ref[0].astype(jnp.bfloat16)   # (tk, H*d_kv)
        v = v_ref[0].astype(jnp.bfloat16)   # (tk, H*d_kv), pre-normalized

        if causal:
            row = qi * tq + lax.broadcasted_iota(jnp.int32, (tq, tk), 0)
            col = ki * tk + lax.broadcasted_iota(jnp.int32, (tq, tk), 1)
            # flash-attn causal mask is aligned to the bottom-right corner.
            keep = col <= row + (seq_k - seq_q)

        for h in range(num_heads):  # static unroll; two MXU matmuls per head
            q_h = q[:, h * d_q:(h + 1) * d_q]
            k_h = k[:, h * d_kv:(h + 1) * d_kv]
            v_h = v[:, h * d_kv:(h + 1) * d_kv]
            s = jnp.dot(q_h, k_h.T, preferred_element_type=jnp.float32)
            p = jax.nn.sigmoid(s + sigmoid_bias)          # f32 (v5e-safe)
            if causal:
                p = jnp.where(keep, p, 0.0)
            acc_ref[:, h * d_kv:(h + 1) * d_kv] += jnp.dot(
                p.astype(jnp.bfloat16), v_h, preferred_element_type=jnp.float32)

    if causal:
        # Skip kv tiles that lie entirely above the causal diagonal.
        live = ki * tk <= qi * tq + (tq - 1) + (seq_k - seq_q)
        pl.when(live)(compute)
    else:
        compute()

    @pl.when(ki == pl.num_programs(2) - 1)
    def _():
        o_ref[0] = acc_ref[...].astype(o_ref.dtype)


def pallas_sigmoid_attention(q, k, v, *, num_heads, sigmoid_bias, causal,
                             out_dtype=jnp.float32, tq=128, tk=256):
    B, Sq, QD = q.shape
    Bk, Sk, KD = k.shape
    assert B == Bk and v.shape == k.shape
    assert QD % num_heads == 0 and KD % num_heads == 0
    d_q = QD // num_heads
    d_kv = KD // num_heads
    assert d_q == d_kv, "QK^T requires equal q/k head dims (flash-attn rule)"

    tq = _pick_tile(Sq, (tq, 64, 32, 16, 8))
    tk = _pick_tile(Sk, (tk, 128, 64, 32, 16, 8))

    kernel = functools.partial(
        _sigmoid_attn_kernel,
        num_heads=num_heads, d_q=d_q, d_kv=d_kv,
        sigmoid_bias=float(sigmoid_bias), causal=bool(causal),
        seq_q=Sq, seq_k=Sk, tq=tq, tk=tk,
    )
    cost = pl.CostEstimate(
        flops=2 * B * Sq * Sk * (QD + KD),
        transcendentals=B * num_heads * Sq * Sk,
        bytes_accessed=int((q.size + k.size + v.size) * np.dtype(q.dtype).itemsize
                           + B * Sq * KD * np.dtype(out_dtype).itemsize),
    )
    return pl.pallas_call(
        kernel,
        out_shape=jax.ShapeDtypeStruct((B, Sq, KD), out_dtype),
        grid=(B, Sq // tq, Sk // tk),
        in_specs=[
            pl.BlockSpec((1, tq, QD), lambda b, i, j: (b, i, 0)),
            pl.BlockSpec((1, tk, KD), lambda b, i, j: (b, j, 0)),
            pl.BlockSpec((1, tk, KD), lambda b, i, j: (b, j, 0)),
        ],
        out_specs=pl.BlockSpec((1, tq, KD), lambda b, i, j: (b, i, 0)),
        scratch_shapes=[pltpu.VMEM((tq, KD), jnp.float32)],
        compiler_params=pltpu.CompilerParams(
            dimension_semantics=("parallel", "parallel", "arbitrary"),
            vmem_limit_bytes=_VMEM_LIMIT,
        ),
        cost_estimate=cost,
    )(q, k, v)


# ---------------------------------------------------------------------------
# Module wrapper (parameter setup + glue reshapes in plain JAX)
# ---------------------------------------------------------------------------
class FlashSigmoidCrossAttentionPallas:
    def __init__(self, q_dim, kv_dim, sigmoid_bias, causal=True, num_heads=8,
                 key=None, attn_tq=128, attn_tk=256):
        assert q_dim % num_heads == 0 and kv_dim % num_heads == 0
        self.q_dim = q_dim
        self.kv_dim = kv_dim
        self.num_heads = num_heads
        self.head_dim_q = q_dim // num_heads
        self.head_dim_kv = kv_dim // num_heads
        assert self.head_dim_q == self.head_dim_kv, \
            "equal q/k head dims required (matches flash-attn requirement)"
        self.sigmoid_bias = sigmoid_bias
        self.causal = causal
        self.attn_tq = attn_tq
        self.attn_tk = attn_tk

        if key is None:
            key = jax.random.PRNGKey(0)
        k1, k2, k3 = jax.random.split(key, 3)
        # torch nn.Linear layout: (out_features, in_features), bias=False.
        self.q_proj_w = 0.02 * jax.random.normal(k1, (q_dim, q_dim), jnp.float32)
        self.kv_proj_w = 0.02 * jax.random.normal(k2, (2 * kv_dim, kv_dim), jnp.float32)
        self.proj_w = 0.02 * jax.random.normal(k3, (q_dim, kv_dim), jnp.float32)
        # LayerNorm(head_dim_kv) default init (v_norm); q_norm/k_norm = Identity.
        self.v_gamma = jnp.ones((1, self.head_dim_kv), jnp.float32)
        self.v_beta = jnp.zeros((1, self.head_dim_kv), jnp.float32)

        # Kernel-side parameters:
        #  * d^-0.5 logit scale folded into q projection weights,
        #  * kv_proj split into contiguous K / V weights (no strided slice),
        #  * weights pre-transposed + cast to bf16 (MXU operands, half DMA).
        scale = float(self.head_dim_q) ** -0.5
        self._q_w_t = (self.q_proj_w * scale).T.astype(jnp.bfloat16)
        self._k_w_t = self.kv_proj_w[:kv_dim].T.astype(jnp.bfloat16)
        self._v_w_t = self.kv_proj_w[kv_dim:].T.astype(jnp.bfloat16)
        self._proj_w_t = self.proj_w.T.astype(jnp.bfloat16)

    def __call__(self, q, kv):
        B, Sq, _ = q.shape
        _, Sk, _ = kv.shape

        q2 = q.reshape(B * Sq, self.q_dim)
        kv2 = kv.reshape(B * Sk, self.kv_dim)

        # Projections (bf16 activations feed the attention kernel).
        q_p = pallas_linear(q2, self._q_w_t, out_dtype=jnp.bfloat16)
        k_p = pallas_linear(kv2, self._k_w_t, out_dtype=jnp.bfloat16)
        v_p = pallas_linear_vnorm(kv2, self._v_w_t, self.v_gamma, self.v_beta,
                                  num_heads=self.num_heads,
                                  head_dim=self.head_dim_kv,
                                  out_dtype=jnp.bfloat16)

        q_p = q_p.reshape(B, Sq, self.q_dim)
        k_p = k_p.reshape(B, Sk, self.kv_dim)
        v_p = v_p.reshape(B, Sk, self.kv_dim)

        # attn_drop=0, proj_drop=0, window_size=(-1,-1), no alibi,
        # qk_norm=False, qk_transform=None (module defaults).
        # TODO(synk): window attention / alibi slopes / dropout not implemented
        # (the module defaults disable them).
        attn_times_v = pallas_sigmoid_attention(
            q_p, k_p, v_p, num_heads=self.num_heads,
            sigmoid_bias=self.sigmoid_bias, causal=self.causal,
            out_dtype=jnp.float32, tq=self.attn_tq, tk=self.attn_tk)

        attn_proj = pallas_linear(
            attn_times_v.reshape(B * Sq, self.kv_dim), self._proj_w_t,
            out_dtype=jnp.float32).reshape(B, Sq, self.q_dim)

        return {"attn_times_v": attn_times_v, "attn_proj": attn_proj}


# ---------------------------------------------------------------------------
# Pure-JAX f32 reference (for sanity check)
# ---------------------------------------------------------------------------
def reference(module, q, kv):
    B, Sq, _ = q.shape
    _, Sk, _ = kv.shape
    H, Dq, Dkv = module.num_heads, module.head_dim_q, module.head_dim_kv
    q_p = (q.reshape(B * Sq, -1) @ module.q_proj_w.T).reshape(B, Sq, H, Dq)
    kv_p = (kv.reshape(B * Sk, -1) @ module.kv_proj_w.T).reshape(B, Sk, 2, H, Dkv)
    k_p, v_p = kv_p[:, :, 0], kv_p[:, :, 1]
    mean = v_p.mean(-1, keepdims=True)
    var = ((v_p - mean) ** 2).mean(-1, keepdims=True)
    v_n = (v_p - mean) / jnp.sqrt(var + 1e-5)
    sf = float(Dq) ** (-0.25)
    s = jnp.einsum("bqhd,bkhd->bhqk", q_p * sf, k_p * sf) + module.sigmoid_bias
    p = jax.nn.sigmoid(s)
    if module.causal:
        row = jnp.arange(Sq)[:, None]
        col = jnp.arange(Sk)[None, :]
        p = jnp.where(col <= row + (Sk - Sq), p, 0.0)
    o = jnp.einsum("bhqk,bkhd->bqhd", p, v_n).reshape(B, Sq, H * Dkv)
    proj = (o.reshape(B * Sq, -1) @ module.proj_w.T).reshape(B, Sq, module.q_dim)
    return {"attn_times_v": o, "attn_proj": proj}


if __name__ == "__main__":
    B, Sq, Skv = 2, 16, 16
    q_dim, kv_dim, num_heads = 32, 32, 4
    sigmoid_bias = -2.0

    root = jax.random.PRNGKey(0)
    k_mod, k_q, k_kv = jax.random.split(root, 3)

    # Tiny attention tiles (tq=tk=8) so that the multi-tile kv accumulation and
    # the causal tile-skip paths are exercised even at this toy sequence length.
    module = FlashSigmoidCrossAttentionPallas(
        q_dim=q_dim, kv_dim=kv_dim, sigmoid_bias=sigmoid_bias,
        causal=True, num_heads=num_heads, key=k_mod, attn_tq=8, attn_tk=8)

    q_in = jax.random.normal(k_q, (B, Sq, q_dim), jnp.float32)
    kv_in = jax.random.normal(k_kv, (B, Skv, kv_dim), jnp.float32)

    out = module(q_in, kv_in)
    jax.block_until_ready(out)

    ref = reference(module, q_in, kv_in)
    # bf16 MXU operands (f32 accumulation) vs f32 reference -> loose tolerance.
    assert jnp.allclose(out["attn_times_v"], ref["attn_times_v"],
                        atol=5e-2, rtol=5e-2), \
        float(jnp.max(jnp.abs(out["attn_times_v"] - ref["attn_times_v"])))
    assert jnp.allclose(out["attn_proj"], ref["attn_proj"],
                        atol=5e-2, rtol=5e-2), \
        float(jnp.max(jnp.abs(out["attn_proj"] - ref["attn_proj"])))

    print("KERNEL_OK")
</pallas_src>

<mosaic_0001>
module attributes {stable_mosaic.version = 11 : i64} {
  func.func @_matmul_kernel(%arg0: i32, %arg1: i32, %arg2: i32, %arg3: memref<32x32xf32, #tpu.memory_space<vmem>>, %arg4: memref<32x32xbf16, #tpu.memory_space<vmem>>, %arg5: memref<32x32xbf16, #tpu.memory_space<vmem>>, %arg6: memref<32x32xf32, #tpu.memory_space<vmem>>) attributes {dimension_semantics = [#tpu.dimension_semantics<parallel>, #tpu.dimension_semantics<parallel>, #tpu.dimension_semantics<arbitrary>], iteration_bounds = array<i64: 1, 1, 1>, scalar_prefetch = 0 : i64, scratch_operands = 1 : i64, tpu.core_type = #tpu.core_type<tc>, window_params = [{transform_indices = @transform_0, window_bounds = array<i64: 32, 32>}, {transform_indices = @transform_1, window_bounds = array<i64: 32, 32>}, {transform_indices = @transform_2, window_bounds = array<i64: 32, 32>}]} {
    %c0_i32 = arith.constant 0 : i32
    %0 = arith.cmpi eq, %arg2, %c0_i32 : i32
    %1 = arith.extui %0 : i1 to i32
    %c0_i32_0 = arith.constant 0 : i32
    %2 = arith.cmpi ne, %1, %c0_i32_0 : i32
    scf.if %2 {
      %cst_10 = arith.constant 0.000000e+00 : f32
      %13 = vector.broadcast %cst_10 : f32 to vector<32x32xf32>
      %c0_11 = arith.constant 0 : index
      %c0_12 = arith.constant 0 : index
      %14 = vector.load %arg6[%c0_11, %c0_12] : memref<32x32xf32, #tpu.memory_space<vmem>>, vector<32x32xf32>
      tpu.vector_store %arg6[%c0_11, %c0_12], %13 {strides = array<i32>} : memref<32x32xf32, #tpu.memory_space<vmem>>, vector<32x32xf32>,
    } else {
    }
    %c0 = arith.constant 0 : index
    %c0_1 = arith.constant 0 : index
    %3 = vector.load %arg6[%c0, %c0_1] : memref<32x32xf32, #tpu.memory_space<vmem>>, vector<32x32xf32>
    %c0_2 = arith.constant 0 : index
    %c0_3 = arith.constant 0 : index
    %4 = vector.load %arg3[%c0_2, %c0_3] : memref<32x32xf32, #tpu.memory_space<vmem>>, vector<32x32xf32>
    %5 = arith.truncf %4 : vector<32x32xf32> to vector<32x32xbf16>
    %c0_4 = arith.constant 0 : index
    %c0_5 = arith.constant 0 : index
    %6 = vector.load %arg4[%c0_4, %c0_5] : memref<32x32xbf16, #tpu.memory_space<vmem>>, vector<32x32xbf16>
    %cst = arith.constant dense<0.000000e+00> : vector<32x32xf32>
    %7 = tpu.matmul %5, %6, %cst {dimension_numbers = #tpu.dot_dimension_numbers<[1], [0], [0], [1], [0, 0, 1, 1], [], []>} : vector<32x32xbf16>, vector<32x32xbf16>, vector<32x32xf32> -> vector<32x32xf32>
    %8 = arith.addf %3, %7 : vector<32x32xf32>
    %c0_6 = arith.constant 0 : index
    %c0_7 = arith.constant 0 : index
    %9 = vector.load %arg6[%c0_6, %c0_7] : memref<32x32xf32, #tpu.memory_space<vmem>>, vector<32x32xf32>
    tpu.vector_store %arg6[%c0_6, %c0_7], %8 {strides = array<i32>} : memref<32x32xf32, #tpu.memory_space<vmem>>, vector<32x32xf32>,
    %c0_i32_8 = arith.constant 0 : i32
    %10 = arith.cmpi eq, %arg2, %c0_i32_8 : i32
    %11 = arith.extui %10 : i1 to i32
    %c0_i32_9 = arith.constant 0 : i32
    %12 = arith.cmpi ne, %11, %c0_i32_9 : i32
    scf.if %12 {
      %c0_10 = arith.constant 0 : index
      %c0_11 = arith.constant 0 : index
      %13 = vector.load %arg6[%c0_10, %c0_11] : memref<32x32xf32, #tpu.memory_space<vmem>>, vector<32x32xf32>
      %14 = arith.truncf %13 : vector<32x32xf32> to vector<32x32xbf16>
      %c0_12 = arith.constant 0 : index
      %c0_13 = arith.constant 0 : index
      %15 = vector.load %arg5[%c0_12, %c0_13] : memref<32x32xbf16, #tpu.memory_space<vmem>>, vector<32x32xbf16>
      tpu.vector_store %arg5[%c0_12, %c0_13], %14 {strides = array<i32>} : memref<32x32xbf16, #tpu.memory_space<vmem>>, vector<32x32xbf16>,
    } else {
    }
    return
  }
  func.func @transform_0(%arg0: i32, %arg1: i32, %arg2: i32) -> (i32, i32) {
    %c0_i32 = arith.constant 0 : i32
    return %arg0, %arg2 : i32, i32
  }
  func.func @transform_1(%arg0: i32, %arg1: i32, %arg2: i32) -> (i32, i32) {
    %c0_i32 = arith.constant 0 : i32
    return %arg2, %arg1 : i32, i32
  }
  func.func @transform_2(%arg0: i32, %arg1: i32, %arg2: i32) -> (i32, i32) {
    %c0_i32 = arith.constant 0 : i32
    return %arg0, %arg1 : i32, i32
  }
}

</mosaic_0001>

<bundles_post_ra>
// kernel: tpu_custom_call.1
= control target key start
LH: loop header
LB: loop body
LE: loop exit
PB: predicated region body
PF: predicated region fallthrough
CT: control target
= control target key end

     0   :  { %7 = vsyncpa [#allocation4], 0  ;;  %s302_s0 = inlined_call_operand.hbm [shape: f32[32,32], index: 0, kind: input, shape index: {}]   ;;  %s303_s1 = inlined_call_operand.hbm [shape: bf16[32,32], index: 1, kind: input, shape index: {}]   ;;  %s304_s2 = inlined_call_operand.hbm [shape: bf16[32,32], index: 2, kind: output, shape index: {}]  }
   0x1   :  { %8 = vsyncpa [#allocation7], 0 }
   0x2   :  { %9 = vsyncpa [#allocation5], 0  ;;  %s14_s11 = sshll.u32 %s302_s0, 4  ;;  %s250_s12 = smov [#allocation3]   ;;  %s15_s11 = int_to_ptr.hbm [resolvable:$true] %s14_s11 }
   0x3   :  { %s16_s13 = sshll.u32 %s250_s12, 4  ;;  %s27_s16 = sshll.u32 %s303_s1, 4  ;;  %s17_s13 = int_to_ptr.vmem [resolvable:$true] %s16_s13  ;;  %s28_s16 = int_to_ptr.hbm [resolvable:$true] %s27_s16 }
   0x4   :  { %s251_s17 = smov 128   ;;  %s252_s18 = smov 8  }
   0x5   :  { %22 = dma.hbm_to_vmem [thread:$0]  %s15_s11, 512, %s17_s13, [#allocation4], %s251_s17, %s251_s17, %s252_s18  }
   0x6   :  { %s253_s19 = smov [#allocation6]   ;;  %s254_s21 = smov 64  }
   0x7   :  { %s29_s20 = sshll.u32 %s253_s19, 4  ;;  %s255_s22 = smov 4   ;;  %s30_s20 = int_to_ptr.vmem [resolvable:$true] %s29_s20 }
   0x8   :  { %35 = dma.hbm_to_vmem [thread:$0]  %s28_s16, 256, %s30_s20, [#allocation7], %s254_s21, %s254_s21, %s255_s22  }
   0x9   :  { %244 = dma.done.wait [#allocation4], 512  }
   0xa   :  { %245 = vsyncadd [#allocation4], 4294966784 }
   0xb   :  { %246 = dma.done.wait [#allocation7], 256  }
   0xc   :  { %247 = vsyncadd [#allocation7], 4294967040  ;;  %vm49_vm0 = vcmask 261120   ;;  %v256_v0 = vmov 0.0   ;;  %v161_v1 = vld [vmem:[#allocation6 + $0x8] sm:$0xff]  ;;  %v160_v2 = vld [vmem:[#allocation6] sm:$0xff] }
   0xd   :  { %50 = vst.msk [vmem:[#allocation2] sm:$0xff] %vm49_vm0, %v256_v0  ;;  %v58_v3 = vld [vmem:[#allocation3] sm:$0xff]  ;;  %93 = vmatpush.bf16.msra.mxu0 %v161_v1  ;;  %162 = vmatpush.bf16.msra.mxu1 %v161_v1  ;;  %v59_v4 = vld [vmem:[#allocation3 + $0x8] sm:$0xff]  ;;  %v60_v5 = vld [vmem:[#allocation3 + $0x10] sm:$0xff]  ;;  %vm125_vm1 = vcmask 257024   ;;  %s257_s0 = smov [#allocation8]  }
   0xe   :  { %51 = vst.msk [vmem:[#allocation2 + $0x8] sm:$0xff] %vm49_vm0, %v256_v0  ;;  %v61_v6 = vld [vmem:[#allocation3 + $0x18] sm:$0xff]  ;;  %v62_v7 = vpack.c.bf16 %v59_v4, %v58_v3  ;;  %s134_s1 = sshll.u32 %s257_s0, 4  ;;  %s136_s25 = sshll.u32 %s304_s2, 4  ;;  %s135_s1 = int_to_ptr.vmem [resolvable:$true] %s134_s1  ;;  %s137_s25 = int_to_ptr.hbm [resolvable:$true] %s136_s25 }
   0xf   :  { %52 = vst.msk [vmem:[#allocation2 + $0x10] sm:$0xff] %vm49_vm0, %v256_v0  ;;  %v63_v8 = vpack.c.bf16 %v61_v6, %v60_v5 }
  0x10   :  { %53 = vst.msk [vmem:[#allocation2 + $0x18] sm:$0xff] %vm49_vm0, %v256_v0 }
  0x11   :  { %94 = vmatpush.bf16.msra.mxu0 %v160_v2  ;;  %163 = vmatpush.bf16.msra.mxu1 %v160_v2 }
  0x14   :  { %158 = vmatmul.msk.bf16.vlgmr.msra.gmra.mxu0 %vm49_vm0, %v62_v7  ;;  %159 = vmatmul.msk.bf16.vlgmr.msra.gmra.mxu1 %vm49_vm0, %v63_v8  ;;  %v54_v9 = vld [vmem:[#allocation2] sm:$0xff] }
  0x15   :  { %v55_v15 = vld [vmem:[#allocation2 + $0x8] sm:$0xff] }
  0x16   :  { %v56_v10 = vld [vmem:[#allocation2 + $0x10] sm:$0xff] }
  0x17   :  { %v57_v16 = vld [vmem:[#allocation2 + $0x18] sm:$0xff] }
  0x91   :  { %v96_v11 = vpop.f32.mrf.mxu0  ;;  %v101_v12 = vpop.f32.mrf.mxu1 }
  0x92   :  { %v106_v13 = vadd.f32 %v96_v11, %v54_v9  ;;  %v108_v14 = vadd.f32 %v101_v12, %v56_v10 }
  0x94   :  { %110 = vst.msk [vmem:[#allocation2] sm:$0xff] %vm49_vm0, %v106_v13 }
  0x95   :  { %112 = vst.msk [vmem:[#allocation2 + $0x10] sm:$0xff] %vm49_vm0, %v108_v14 }
  0x99   :  { %v98_v17 = vpop.f32.mrf.mxu0  ;;  %v103_v18 = vpop.f32.mrf.mxu1 }
  0x9a   :  { %v107_v19 = vadd.f32 %v98_v17, %v55_v15  ;;  %v109_v20 = vadd.f32 %v103_v18, %v57_v16 }
  0x9b   :  { %v117_v21 = vld [vmem:[#allocation2] sm:$0xff] }
  0x9c   :  { %111 = vst.msk [vmem:[#allocation2 + $0x8] sm:$0xff] %vm49_vm0, %v107_v19  ;;  %v119_v22 = vld [vmem:[#allocation2 + $0x10] sm:$0xff]  ;;  %v121_v23 = vpack.c.bf16 %v117_v21, %v117_v21 }
  0x9d   :  { %113 = vst.msk [vmem:[#allocation2 + $0x18] sm:$0xff] %vm49_vm0, %v109_v20  ;;  %v123_v24 = vpack.c.bf16 %v119_v22, %v119_v22 }
  0x9e   :  { %126 = vst.msk [vmem:[#allocation8] sm:$0xf] %vm125_vm1, %v121_v23 }
  0x9f   :  { %128 = vst.msk [vmem:[#allocation8 + $0x8] sm:$0xf] %vm125_vm1, %v123_v24 }
  0xa3   :  { %v118_v25 = vld [vmem:[#allocation2 + $0x8] sm:$0xff] }
  0xa4   :  { %v120_v26 = vld [vmem:[#allocation2 + $0x18] sm:$0xff]  ;;  %v122_v27 = vpack.c.bf16 %v118_v25, %v118_v25 }
  0xa5   :  { %v124_v28 = vpack.c.bf16 %v120_v26, %v120_v26 }
  0xa6   :  { %127 = vst.msk [vmem:[#allocation8 + $0x4] sm:$0xf] %vm125_vm1, %v122_v27 }
  0xa7   :  { %129 = vst.msk [vmem:[#allocation8 + $0xc] sm:$0xf] %vm125_vm1, %v124_v28 }
  0xa8   :  { %142 = dma.vmem_to_hbm [thread:$0]  %s135_s1, 256, %s137_s25, [#allocation5], %s254_s21, %s254_s21, %s255_s22  }
  0xa9   :  { %248 = dma.done.wait [#allocation5], 256  }
  0xaa   :  { %249 = vsyncadd [#allocation5], 4294967040 }
  0xab   :  { %147 = vsyncpa [#allocation4], 1 }
  0xac   :  { %148 = vsyncpa [#allocation7], 1 }
  0xad   :  { %149 = vsyncpa [#allocation5], 1 }

</bundles_post_ra>
